<compile_context>
chip_gen: v5e
topology: v5e:2x2
jax: 0.10.0
libtpu: 0.0.40
codegen_flags: <defaults>
</compile_context>

<pallas_src>
import functools

import jax
import jax.numpy as jnp
from jax import lax
from jax.experimental import pallas as pl
from jax.experimental.pallas import tpu as pltpu

LANES = 128
SUBLANES = 8
MAX_BLOCK_ROWS = 2048   # (2048,128) f32 tile = 1 MiB; 2 inputs x 2 buffers = 4 MiB VMEM
NUM_CORES = 2           # leading "parallel" grid axis (megacore on v7x; harmless elsewhere)


def _bce_kernel(x_ref, t_ref, lsum_ref, ssum_ref, min_ref, max_ref, *,
                n, need_mask, want_logits, want_sigmoid, want_minmax):
    p = pl.program_id(0)           # parallel (core) axis
    s = pl.program_id(1)           # reduction axis
    steps = pl.num_programs(1)

    @pl.when(s == 0)
    def _init():
        lsum_ref[...] = jnp.zeros((SUBLANES, LANES), jnp.float32)
        ssum_ref[...] = jnp.zeros((SUBLANES, LANES), jnp.float32)
        min_ref[...] = jnp.full((SUBLANES, LANES), jnp.inf, jnp.float32)
        max_ref[...] = jnp.full((SUBLANES, LANES), -jnp.inf, jnp.float32)

    x = x_ref[...].astype(jnp.float32)
    t = t_ref[...].astype(jnp.float32)
    rows = x.shape[0]
    groups = rows // SUBLANES

    if need_mask:
        # Validity mask from the *logical* flat element index.  Blocks past the
        # end of the data (duplicated clamped blocks, or the ragged padded
        # tail) are masked out so they contribute nothing.
        # TODO(synk): int32 flat index limits n to < 2^31 elements.
        block_id = p * steps + s
        row_ids = lax.broadcasted_iota(jnp.int32, (rows, LANES), 0)
        col_ids = lax.broadcasted_iota(jnp.int32, (rows, LANES), 1)
        flat_idx = (block_id * rows + row_ids) * LANES + col_ids
        mask = flat_idx < n
    else:
        mask = None

    def _masked(v, fill):
        return v if mask is None else jnp.where(mask, v, fill)

    if want_minmax:
        xg_min = _masked(x, jnp.inf).reshape(groups, SUBLANES, LANES)
        xg_max = _masked(x, -jnp.inf).reshape(groups, SUBLANES, LANES)
        min_ref[...] = jnp.minimum(min_ref[...], jnp.min(xg_min, axis=0))
        max_ref[...] = jnp.maximum(max_ref[...], jnp.max(xg_max, axis=0))

    if want_logits:
        # BCEWithLogitsLoss (numerically stable form, matches PyTorch):
        #   loss = max(x, 0) - x*t + log1p(exp(-|x|))
        logits_loss = jnp.maximum(x, 0.0) - x * t + jnp.log1p(jnp.exp(-jnp.abs(x)))
        logits_loss = _masked(logits_loss, 0.0)
        lsum_ref[...] += jnp.sum(logits_loss.reshape(groups, SUBLANES, LANES), axis=0)

    if want_sigmoid:
        # BCELoss with PyTorch's clamp of the log terms at -100:
        #   loss = -(t * clamp(log(x), -100) + (1-t) * clamp(log(1-x), -100))
        # Note: when x is a raw logit (outside [0,1]) this branch can produce
        # NaN; in 'auto' mode the wrapper's jnp.where selects the logits sum in
        # exactly that case, so the returned value is still correct.
        log_x = jnp.maximum(jnp.log(x), -100.0)
        log_1mx = jnp.maximum(jnp.log(1.0 - x), -100.0)
        sig_loss = -(t * log_x + (1.0 - t) * log_1mx)
        sig_loss = _masked(sig_loss, 0.0)
        ssum_ref[...] += jnp.sum(sig_loss.reshape(groups, SUBLANES, LANES), axis=0)


def _pallas_bce_reductions(x, target, *, want_logits, want_sigmoid, want_minmax):
    """Returns (logits_bce_sum, sigmoid_bce_sum, x_min, x_max) as f32 scalars."""
    n = x.size
    xf = x.reshape(-1)
    tf = target.reshape(-1)

    tile_elems = SUBLANES * LANES                    # 1024
    padded_n = -(-n // tile_elems) * tile_elems
    if padded_n != n:
        # Only a ragged tail forces a copy; aligned sizes reshape for free.
        xf = jnp.pad(xf, (0, padded_n - n), constant_values=0.5)
        tf = jnp.pad(tf, (0, padded_n - n), constant_values=0.0)

    n_rows = padded_n // LANES                       # multiple of 8
    x2d = xf.reshape(n_rows, LANES)
    t2d = tf.reshape(n_rows, LANES)

    block_rows = min(MAX_BLOCK_ROWS, n_rows)
    total_blocks = -(-n_rows // block_rows)
    num_cores = NUM_CORES if total_blocks >= NUM_CORES else 1
    steps = -(-total_blocks // num_cores)

    # Statically skip all masking work when every logical block is a full,
    # in-bounds block and there was no ragged tail (the common case).
    need_mask = (padded_n != n
                 or num_cores * steps != total_blocks
                 or n_rows % block_rows != 0)

    def in_map(p, s):
        # Clamp so the DMA never starts past the array; duplicated blocks are
        # fully masked out inside the kernel via the logical flat index.
        return (jnp.minimum(p * steps + s, total_blocks - 1), 0)

    tile_spec = pl.BlockSpec((block_rows, LANES), in_map)
    acc_spec = pl.BlockSpec((None, SUBLANES, LANES), lambda p, s: (p, 0, 0))
    acc_shape = jax.ShapeDtypeStruct((num_cores, SUBLANES, LANES), jnp.float32)

    kernel = functools.partial(
        _bce_kernel, n=n, need_mask=need_mask,
        want_logits=want_logits, want_sigmoid=want_sigmoid, want_minmax=want_minmax)

    lsum, ssum, xmin, xmax = pl.pallas_call(
        kernel,
        grid=(num_cores, steps),
        in_specs=[tile_spec, tile_spec],
        out_specs=[acc_spec, acc_spec, acc_spec, acc_spec],
        out_shape=[acc_shape, acc_shape, acc_shape, acc_shape],
        compiler_params=pltpu.CompilerParams(
            dimension_semantics=("parallel", "arbitrary")),
    )(x2d, t2d)

    # Final cross-lane reductions happen once, on tiny (num_cores, 8, 128) arrays.
    return jnp.sum(lsum), jnp.sum(ssum), jnp.min(xmin), jnp.max(xmax)


def binary_cross_entropy(x, target, output_type="auto", reduction="mean"):
    """Forward pass of torchstudio BinaryCrossEntropy (weight=None)."""
    assert x.shape == target.shape
    n = x.size

    want_logits = output_type in ("auto", "logits")
    want_sigmoid = output_type in ("auto", "sigmoid")
    want_minmax = output_type == "auto"

    lsum, ssum, xmin, xmax = _pallas_bce_reductions(
        x, target,
        want_logits=want_logits, want_sigmoid=want_sigmoid, want_minmax=want_minmax)

    if output_type == "auto":
        # TODO(synk): PyTorch module mutates self.output_type on the first call;
        # here the 'auto' decision is recomputed per call (same forward value).
        use_logits = jnp.logical_or(xmin < 0.0, xmax > 1.0)
        total = jnp.where(use_logits, lsum, ssum)
    elif output_type == "logits":
        total = lsum
    else:  # 'sigmoid'
        total = ssum

    if reduction == "mean":
        return total / jnp.float32(n)
    elif reduction == "sum":
        return total
    else:
        # TODO(synk): reduction='none' (per-element loss tensor) not implemented.
        raise NotImplementedError("reduction='none' not implemented")


if __name__ == "__main__":
    key = jax.random.PRNGKey(0)
    k1, k2, k3, k4, k5 = jax.random.split(key, 5)

    # Pure-JAX references.
    def ref_logits(x, t, red="mean"):
        x = x.astype(jnp.float32); t = t.astype(jnp.float32)
        l = jnp.maximum(x, 0.0) - x * t + jnp.log1p(jnp.exp(-jnp.abs(x)))
        return jnp.mean(l) if red == "mean" else jnp.sum(l)

    def ref_sigmoid(x, t, red="mean"):
        x = x.astype(jnp.float32); t = t.astype(jnp.float32)
        lx = jnp.maximum(jnp.log(x), -100.0)
        l1 = jnp.maximum(jnp.log(1.0 - x), -100.0)
        l = -(t * lx + (1.0 - t) * l1)
        return jnp.mean(l) if red == "mean" else jnp.sum(l)

    # Case 1: raw logits (contains negatives) -> auto picks the BCEWithLogits path.
    x_logits = jax.random.normal(k1, (2, 4, 16, 16), dtype=jnp.float32)
    target = (jax.random.uniform(k2, (2, 4, 16, 16)) > 0.5).astype(jnp.float32)
    loss_logits = binary_cross_entropy(x_logits, target, output_type="auto")

    # Case 2: probabilities in [0, 1] -> auto picks the BCELoss path.
    x_prob = jax.random.uniform(k3, (2, 4, 16, 16), dtype=jnp.float32)
    loss_prob = binary_cross_entropy(x_prob, target, output_type="auto")

    # Case 3: ragged element count (not a multiple of 1024) exercises pad + mask.
    x_r = jax.random.normal(k4, (3, 5, 7), dtype=jnp.float32)
    t_r = (jax.random.uniform(k2, (3, 5, 7)) > 0.5).astype(jnp.float32)
    loss_r = binary_cross_entropy(x_r, t_r, output_type="logits")

    # Case 4: larger tensor with an odd block count -> exercises the two-core
    # split with a clamped/masked duplicate block, 'sigmoid' branch only.
    x_big = jax.random.uniform(k5, (3, 64, 64, 64), dtype=jnp.float32)
    t_big = (jax.random.uniform(k1, (3, 64, 64, 64)) > 0.5).astype(jnp.float32)
    loss_big = binary_cross_entropy(x_big, t_big, output_type="sigmoid")

    jax.block_until_ready((loss_logits, loss_prob, loss_r, loss_big))

    assert loss_logits.shape == () and loss_prob.shape == () and loss_r.shape == ()
    assert bool(jnp.isfinite(loss_logits)) and bool(jnp.isfinite(loss_prob))
    assert bool(jnp.allclose(loss_logits, ref_logits(x_logits, target), rtol=2e-5, atol=1e-5))
    assert bool(jnp.allclose(loss_prob, ref_sigmoid(x_prob, target), rtol=2e-5, atol=1e-5))
    assert bool(jnp.allclose(loss_r, ref_logits(x_r, t_r), rtol=2e-5, atol=1e-5))
    assert bool(jnp.allclose(loss_big, ref_sigmoid(x_big, t_big), rtol=1e-4, atol=1e-5))
    print("KERNEL_OK")
</pallas_src>

<mosaic_0001>
module attributes {stable_mosaic.version = 11 : i64} {
  func.func @_bce_kernel(%arg0: i32, %arg1: i32, %arg2: memref<16x128xf32, #tpu.memory_space<vmem>>, %arg3: memref<16x128xf32, #tpu.memory_space<vmem>>, %arg4: memref<1x8x128xf32, #tpu.memory_space<vmem>>, %arg5: memref<1x8x128xf32, #tpu.memory_space<vmem>>, %arg6: memref<1x8x128xf32, #tpu.memory_space<vmem>>, %arg7: memref<1x8x128xf32, #tpu.memory_space<vmem>>) attributes {dimension_semantics = [#tpu.dimension_semantics<parallel>, #tpu.dimension_semantics<arbitrary>], iteration_bounds = array<i64: 1, 1>, scalar_prefetch = 0 : i64, scratch_operands = 0 : i64, tpu.core_type = #tpu.core_type<tc>, window_params = [{transform_indices = @transform_0, window_bounds = array<i64: 16, 128>}, {transform_indices = @transform_1, window_bounds = array<i64: 16, 128>}, {transform_indices = @transform_2, window_bounds = array<i64: 1, 8, 128>}, {transform_indices = @transform_3, window_bounds = array<i64: 1, 8, 128>}, {transform_indices = @transform_4, window_bounds = array<i64: 1, 8, 128>}, {transform_indices = @transform_5, window_bounds = array<i64: 1, 8, 128>}]} {
    %c0_i32 = arith.constant 0 : i32
    %0 = arith.cmpi eq, %arg1, %c0_i32 : i32
    %1 = arith.extui %0 : i1 to i32
    %c0_i32_0 = arith.constant 0 : i32
    %2 = arith.cmpi ne, %1, %c0_i32_0 : i32
    scf.if %2 {
      %cst_38 = arith.constant 0.000000e+00 : f32
      %62 = vector.broadcast %cst_38 : f32 to vector<8x128xf32>
      %c0_39 = arith.constant 0 : index
      %c0_40 = arith.constant 0 : index
      %c0_41 = arith.constant 0 : index
      %63 = vector.load %arg4[%c0_39, %c0_40, %c0_41] : memref<1x8x128xf32, #tpu.memory_space<vmem>>, vector<1x8x128xf32>
      %64 = vector.shape_cast %63 : vector<1x8x128xf32> to vector<8x128xf32>
      %65 = vector.shape_cast %62 : vector<8x128xf32> to vector<1x8x128xf32>
      tpu.vector_store %arg4[%c0_39, %c0_40, %c0_41], %65 {strides = array<i32>} : memref<1x8x128xf32, #tpu.memory_space<vmem>>, vector<1x8x128xf32>,
      %cst_42 = arith.constant 0.000000e+00 : f32
      %66 = vector.broadcast %cst_42 : f32 to vector<8x128xf32>
      %c0_43 = arith.constant 0 : index
      %c0_44 = arith.constant 0 : index
      %c0_45 = arith.constant 0 : index
      %67 = vector.load %arg5[%c0_43, %c0_44, %c0_45] : memref<1x8x128xf32, #tpu.memory_space<vmem>>, vector<1x8x128xf32>
      %68 = vector.shape_cast %67 : vector<1x8x128xf32> to vector<8x128xf32>
      %69 = vector.shape_cast %66 : vector<8x128xf32> to vector<1x8x128xf32>
      tpu.vector_store %arg5[%c0_43, %c0_44, %c0_45], %69 {strides = array<i32>} : memref<1x8x128xf32, #tpu.memory_space<vmem>>, vector<1x8x128xf32>,
      %cst_46 = arith.constant 0x7F800000 : f32
      %70 = vector.broadcast %cst_46 : f32 to vector<8x128xf32>
      %c0_47 = arith.constant 0 : index
      %c0_48 = arith.constant 0 : index
      %c0_49 = arith.constant 0 : index
      %71 = vector.load %arg6[%c0_47, %c0_48, %c0_49] : memref<1x8x128xf32, #tpu.memory_space<vmem>>, vector<1x8x128xf32>
      %72 = vector.shape_cast %71 : vector<1x8x128xf32> to vector<8x128xf32>
      %73 = vector.shape_cast %70 : vector<8x128xf32> to vector<1x8x128xf32>
      tpu.vector_store %arg6[%c0_47, %c0_48, %c0_49], %73 {strides = array<i32>} : memref<1x8x128xf32, #tpu.memory_space<vmem>>, vector<1x8x128xf32>,
      %cst_50 = arith.constant 0xFF800000 : f32
      %74 = vector.broadcast %cst_50 : f32 to vector<8x128xf32>
      %c0_51 = arith.constant 0 : index
      %c0_52 = arith.constant 0 : index
      %c0_53 = arith.constant 0 : index
      %75 = vector.load %arg7[%c0_51, %c0_52, %c0_53] : memref<1x8x128xf32, #tpu.memory_space<vmem>>, vector<1x8x128xf32>
      %76 = vector.shape_cast %75 : vector<1x8x128xf32> to vector<8x128xf32>
      %77 = vector.shape_cast %74 : vector<8x128xf32> to vector<1x8x128xf32>
      tpu.vector_store %arg7[%c0_51, %c0_52, %c0_53], %77 {strides = array<i32>} : memref<1x8x128xf32, #tpu.memory_space<vmem>>, vector<1x8x128xf32>,
    } else {
    }
    %c0 = arith.constant 0 : index
    %c0_1 = arith.constant 0 : index
    %3 = vector.load %arg2[%c0, %c0_1] : memref<16x128xf32, #tpu.memory_space<vmem>>, vector<16x128xf32>
    %c0_2 = arith.constant 0 : index
    %c0_3 = arith.constant 0 : index
    %4 = vector.load %arg3[%c0_2, %c0_3] : memref<16x128xf32, #tpu.memory_space<vmem>>, vector<16x128xf32>
    %5 = vector.shape_cast %3 : vector<16x128xf32> to vector<2x8x128xf32>
    %6 = vector.shape_cast %3 : vector<16x128xf32> to vector<2x8x128xf32>
    %c0_4 = arith.constant 0 : index
    %c0_5 = arith.constant 0 : index
    %c0_6 = arith.constant 0 : index
    %7 = vector.load %arg6[%c0_4, %c0_5, %c0_6] : memref<1x8x128xf32, #tpu.memory_space<vmem>>, vector<1x8x128xf32>
    %8 = vector.shape_cast %7 : vector<1x8x128xf32> to vector<8x128xf32>
    %cst = arith.constant dense<0x7F800000> : vector<8x128xf32>
    %9 = vector.multi_reduction <minimumf>, %5, %cst [0] : vector<2x8x128xf32> to vector<8x128xf32>
    %10 = arith.minimumf %8, %9 : vector<8x128xf32>
    %c0_7 = arith.constant 0 : index
    %c0_8 = arith.constant 0 : index
    %c0_9 = arith.constant 0 : index
    %11 = vector.load %arg6[%c0_7, %c0_8, %c0_9] : memref<1x8x128xf32, #tpu.memory_space<vmem>>, vector<1x8x128xf32>
    %12 = vector.shape_cast %11 : vector<1x8x128xf32> to vector<8x128xf32>
    %13 = vector.shape_cast %10 : vector<8x128xf32> to vector<1x8x128xf32>
    tpu.vector_store %arg6[%c0_7, %c0_8, %c0_9], %13 {strides = array<i32>} : memref<1x8x128xf32, #tpu.memory_space<vmem>>, vector<1x8x128xf32>,
    %c0_10 = arith.constant 0 : index
    %c0_11 = arith.constant 0 : index
    %c0_12 = arith.constant 0 : index
    %14 = vector.load %arg7[%c0_10, %c0_11, %c0_12] : memref<1x8x128xf32, #tpu.memory_space<vmem>>, vector<1x8x128xf32>
    %15 = vector.shape_cast %14 : vector<1x8x128xf32> to vector<8x128xf32>
    %cst_13 = arith.constant dense<0xFF800000> : vector<8x128xf32>
    %16 = vector.multi_reduction <maximumf>, %6, %cst_13 [0] : vector<2x8x128xf32> to vector<8x128xf32>
    %17 = arith.maximumf %15, %16 : vector<8x128xf32>
    %c0_14 = arith.constant 0 : index
    %c0_15 = arith.constant 0 : index
    %c0_16 = arith.constant 0 : index
    %18 = vector.load %arg7[%c0_14, %c0_15, %c0_16] : memref<1x8x128xf32, #tpu.memory_space<vmem>>, vector<1x8x128xf32>
    %19 = vector.shape_cast %18 : vector<1x8x128xf32> to vector<8x128xf32>
    %20 = vector.shape_cast %17 : vector<8x128xf32> to vector<1x8x128xf32>
    tpu.vector_store %arg7[%c0_14, %c0_15, %c0_16], %20 {strides = array<i32>} : memref<1x8x128xf32, #tpu.memory_space<vmem>>, vector<1x8x128xf32>,
    %cst_17 = arith.constant 0.000000e+00 : f32
    %21 = vector.broadcast %cst_17 : f32 to vector<16x128xf32>
    %22 = arith.maximumf %3, %21 : vector<16x128xf32>
    %23 = arith.mulf %3, %4 : vector<16x128xf32>
    %24 = arith.subf %22, %23 : vector<16x128xf32>
    %25 = math.absf %3 : vector<16x128xf32>
    %cst_18 = arith.constant 0.000000e+00 : f32
    %26 = vector.broadcast %cst_18 : f32 to vector<16x128xf32>
    %27 = arith.subf %26, %25 : vector<16x128xf32>
    %28 = math.exp %27 : vector<16x128xf32>
    %29 = math.log1p %28 : vector<16x128xf32>
    %30 = arith.addf %24, %29 : vector<16x128xf32>
    %c0_19 = arith.constant 0 : index
    %c0_20 = arith.constant 0 : index
    %c0_21 = arith.constant 0 : index
    %31 = vector.load %arg4[%c0_19, %c0_20, %c0_21] : memref<1x8x128xf32, #tpu.memory_space<vmem>>, vector<1x8x128xf32>
    %32 = vector.shape_cast %31 : vector<1x8x128xf32> to vector<8x128xf32>
    %33 = vector.shape_cast %30 : vector<16x128xf32> to vector<2x8x128xf32>
    %cst_22 = arith.constant dense<0.000000e+00> : vector<8x128xf32>
    %34 = vector.multi_reduction <add>, %33, %cst_22 [0] : vector<2x8x128xf32> to vector<8x128xf32>
    %35 = arith.addf %32, %34 : vector<8x128xf32>
    %c0_23 = arith.constant 0 : index
    %c0_24 = arith.constant 0 : index
    %c0_25 = arith.constant 0 : index
    %36 = vector.load %arg4[%c0_23, %c0_24, %c0_25] : memref<1x8x128xf32, #tpu.memory_space<vmem>>, vector<1x8x128xf32>
    %37 = vector.shape_cast %36 : vector<1x8x128xf32> to vector<8x128xf32>
    %38 = vector.shape_cast %35 : vector<8x128xf32> to vector<1x8x128xf32>
    tpu.vector_store %arg4[%c0_23, %c0_24, %c0_25], %38 {strides = array<i32>} : memref<1x8x128xf32, #tpu.memory_space<vmem>>, vector<1x8x128xf32>,
    %39 = math.log %3 : vector<16x128xf32>
    %cst_26 = arith.constant -1.000000e+02 : f32
    %40 = vector.broadcast %cst_26 : f32 to vector<16x128xf32>
    %41 = arith.maximumf %39, %40 : vector<16x128xf32>
    %cst_27 = arith.constant 1.000000e+00 : f32
    %42 = vector.broadcast %cst_27 : f32 to vector<16x128xf32>
    %43 = arith.subf %42, %3 : vector<16x128xf32>
    %44 = math.log %43 : vector<16x128xf32>
    %cst_28 = arith.constant -1.000000e+02 : f32
    %45 = vector.broadcast %cst_28 : f32 to vector<16x128xf32>
    %46 = arith.maximumf %44, %45 : vector<16x128xf32>
    %47 = arith.mulf %4, %41 : vector<16x128xf32>
    %cst_29 = arith.constant 1.000000e+00 : f32
    %48 = vector.broadcast %cst_29 : f32 to vector<16x128xf32>
    %49 = arith.subf %48, %4 : vector<16x128xf32>
    %50 = arith.mulf %49, %46 : vector<16x128xf32>
    %51 = arith.addf %47, %50 : vector<16x128xf32>
    %cst_30 = arith.constant 0.000000e+00 : f32
    %52 = vector.broadcast %cst_30 : f32 to vector<16x128xf32>
    %53 = arith.subf %52, %51 : vector<16x128xf32>
    %c0_31 = arith.constant 0 : index
    %c0_32 = arith.constant 0 : index
    %c0_33 = arith.constant 0 : index
    %54 = vector.load %arg5[%c0_31, %c0_32, %c0_33] : memref<1x8x128xf32, #tpu.memory_space<vmem>>, vector<1x8x128xf32>
    %55 = vector.shape_cast %54 : vector<1x8x128xf32> to vector<8x128xf32>
    %56 = vector.shape_cast %53 : vector<16x128xf32> to vector<2x8x128xf32>
    %cst_34 = arith.constant dense<0.000000e+00> : vector<8x128xf32>
    %57 = vector.multi_reduction <add>, %56, %cst_34 [0] : vector<2x8x128xf32> to vector<8x128xf32>
    %58 = arith.addf %55, %57 : vector<8x128xf32>
    %c0_35 = arith.constant 0 : index
    %c0_36 = arith.constant 0 : index
    %c0_37 = arith.constant 0 : index
    %59 = vector.load %arg5[%c0_35, %c0_36, %c0_37] : memref<1x8x128xf32, #tpu.memory_space<vmem>>, vector<1x8x128xf32>
    %60 = vector.shape_cast %59 : vector<1x8x128xf32> to vector<8x128xf32>
    %61 = vector.shape_cast %58 : vector<8x128xf32> to vector<1x8x128xf32>
    tpu.vector_store %arg5[%c0_35, %c0_36, %c0_37], %61 {strides = array<i32>} : memref<1x8x128xf32, #tpu.memory_space<vmem>>, vector<1x8x128xf32>,
    return
  }
  func.func @transform_0(%arg0: i32, %arg1: i32) -> (i32, i32) {
    %c1_i32 = arith.constant 1 : i32
    %0 = arith.muli %arg0, %c1_i32 : i32
    %1 = arith.addi %0, %arg1 : i32
    %c0_i32 = arith.constant 0 : i32
    %2 = arith.minsi %1, %c0_i32 : i32
    %c0_i32_0 = arith.constant 0 : i32
    %c0_i32_1 = arith.constant 0 : i32
    return %2, %c0_i32_0 : i32, i32
  }
  func.func @transform_1(%arg0: i32, %arg1: i32) -> (i32, i32) {
    %c1_i32 = arith.constant 1 : i32
    %0 = arith.muli %arg0, %c1_i32 : i32
    %1 = arith.addi %0, %arg1 : i32
    %c0_i32 = arith.constant 0 : i32
    %2 = arith.minsi %1, %c0_i32 : i32
    %c0_i32_0 = arith.constant 0 : i32
    %c0_i32_1 = arith.constant 0 : i32
    return %2, %c0_i32_0 : i32, i32
  }
  func.func @transform_2(%arg0: i32, %arg1: i32) -> (i32, i32, i32) {
    %c0_i32 = arith.constant 0 : i32
    %c0_i32_0 = arith.constant 0 : i32
    %c0_i32_1 = arith.constant 0 : i32
    return %arg0, %c0_i32, %c0_i32_0 : i32, i32, i32
  }
  func.func @transform_3(%arg0: i32, %arg1: i32) -> (i32, i32, i32) {
    %c0_i32 = arith.constant 0 : i32
    %c0_i32_0 = arith.constant 0 : i32
    %c0_i32_1 = arith.constant 0 : i32
    return %arg0, %c0_i32, %c0_i32_0 : i32, i32, i32
  }
  func.func @transform_4(%arg0: i32, %arg1: i32) -> (i32, i32, i32) {
    %c0_i32 = arith.constant 0 : i32
    %c0_i32_0 = arith.constant 0 : i32
    %c0_i32_1 = arith.constant 0 : i32
    return %arg0, %c0_i32, %c0_i32_0 : i32, i32, i32
  }
  func.func @transform_5(%arg0: i32, %arg1: i32) -> (i32, i32, i32) {
    %c0_i32 = arith.constant 0 : i32
    %c0_i32_0 = arith.constant 0 : i32
    %c0_i32_1 = arith.constant 0 : i32
    return %arg0, %c0_i32, %c0_i32_0 : i32, i32, i32
  }
}

</mosaic_0001>

<bundles_post_ra>
// kernel: tpu_custom_call.1
= control target key start
LH: loop header
LB: loop body
LE: loop exit
PB: predicated region body
PF: predicated region fallthrough
CT: control target
= control target key end

     0   :  { %11 = vsyncpa [#allocation3], 0  ;;  %s480_s0 = inlined_call_operand.hbm [shape: f32[16,128], index: 0, kind: input, shape index: {}]   ;;  %s481_s1 = inlined_call_operand.hbm [shape: f32[16,128], index: 1, kind: input, shape index: {}]   ;;  %s482_s2 = inlined_call_operand.hbm [shape: f32[1,8,128], index: 2, kind: output, shape index: {0}]   ;;  %s483_s3 = inlined_call_operand.hbm [shape: f32[1,8,128], index: 3, kind: output, shape index: {1}]   ;;  %s484_s4 = inlined_call_operand.hbm [shape: f32[1,8,128], index: 4, kind: output, shape index: {2}]   ;;  %s485_s5 = inlined_call_operand.hbm [shape: f32[1,8,128], index: 5, kind: output, shape index: {3}]  }
   0x1   :  { %12 = vsyncpa [#allocation6], 0 }
   0x2   :  { %13 = vsyncpa [#allocation4], 0 }
   0x3   :  { %14 = vsyncpa [#allocation9], 0 }
   0x4   :  { %15 = vsyncpa [#allocation12], 0  ;;  %s26_s20 = sshll.u32 %s480_s0, 4  ;;  %s406_s21 = smov [#allocation2]   ;;  %s27_s20 = int_to_ptr.hbm [resolvable:$true] %s26_s20 }
   0x5   :  { %s28_s22 = sshll.u32 %s406_s21, 4  ;;  %s45_s25 = sshll.u32 %s481_s1, 4  ;;  %s29_s22 = int_to_ptr.vmem [resolvable:$true] %s28_s22  ;;  %s46_s25 = int_to_ptr.hbm [resolvable:$true] %s45_s25 }
   0x6   :  { %s407_s26 = smov 128   ;;  %s408_s27 = smov 8  }
   0x7   :  { %34 = dma.hbm_to_vmem [thread:$0]  %s27_s20, 256, %s29_s22, [#allocation3], %s407_s26, %s407_s26, %s408_s27  }
   0x8   :  { %s409_s28 = smov [#allocation5]  }
   0x9   :  { %s47_s29 = sshll.u32 %s409_s28, 4  ;;  %s48_s29 = int_to_ptr.vmem [resolvable:$true] %s47_s29 }
   0xa   :  { %53 = dma.hbm_to_vmem [thread:$0]  %s46_s25, 256, %s48_s29, [#allocation6], %s407_s26, %s407_s26, %s408_s27  }
   0xb   :  { %396 = dma.done.wait [#allocation3], 256  }
   0xc   :  { %397 = vsyncadd [#allocation3], 4294967040 }
   0xd   :  { %398 = dma.done.wait [#allocation6], 256  }
   0xe   :  { %399 = vsyncadd [#allocation6], 4294967040  ;;  %v450_v0 = vld [vmem:[#allocation2] sm:$0xff]  ;;  %v452_v1 = vld [vmem:[#allocation2 + $0x8] sm:$0xff]  ;;  %s410_s0 = smov [#allocation11]   ;;  %s196_s7 = sshll.u32 %s485_s5, 4  ;;  %s197_s7 = int_to_ptr.hbm [resolvable:$true] %s196_s7 }
   0xf   :  { %v96_v2 = vand.u32 2147483647, %v450_v0  ;;  %v97_v3 = vand.u32 2147483647, %v452_v1  ;;  %236 = vlog2.f32 %v450_v0  ;;  %v134_v4 = vsub.f32 1.0, %v450_v0  ;;  %s194_s1 = sshll.u32 %s410_s0, 4  ;;  %s195_s1 = int_to_ptr.vmem [resolvable:$true] %s194_s1 }
  0x10   :  { %238 = vlog2.f32 %v452_v1  ;;  %v135_v5 = vsub.f32 1.0, %v452_v1  ;;  %v83_v8 = vmin.f32 %v450_v0, %v452_v1  ;;  %v87_v9 = vmax.f32 %v450_v0, %v452_v1  ;;  %v80_v13 = vld [vmem:[#allocation5] sm:$0xff]  ;;  %v81_v15 = vld [vmem:[#allocation5 + $0x8] sm:$0xff]  ;;  %s411_s5 = smov [#allocation8]   ;;  %s174_s11 = sshll.u32 %s483_s3, 4  ;;  %s175_s11 = int_to_ptr.hbm [resolvable:$true] %s174_s11 }
  0x11   :  { %v98_v6 = vsub.f32 0.0, %v96_v2  ;;  %v99_v7 = vsub.f32 0.0, %v97_v3  ;;  %240 = vlog2.f32 %v134_v4  ;;  %v144_v22 = vsub.f32 1.0, %v80_v13  ;;  %s172_s8 = sshll.u32 %s411_s5, 4  ;;  %s412_s12 = smov [#allocation10]   ;;  %s173_s8 = int_to_ptr.vmem [resolvable:$true] %s172_s8 }
  0x12   :  { %242 = vlog2.f32 %v135_v5  ;;  %85 = vst [vmem:[#allocation10] sm:$0xff] %v83_v8  ;;  %v145_v25 = vsub.f32 1.0, %v81_v15  ;;  %v90_v40 = vmax.f32 %v450_v0, 0.0  ;;  %v92_v43 = vmul.f32 %v80_v13, %v450_v0  ;;  %s183_s13 = sshll.u32 %s412_s12, 4  ;;  %s185_s16 = sshll.u32 %s484_s4, 4  ;;  %s184_s13 = int_to_ptr.vmem [resolvable:$true] %s183_s13  ;;  %s186_s16 = int_to_ptr.hbm [resolvable:$true] %s185_s16 }
  0x13   :  { %v100_v10 = vmul.f32 1.442695, %v98_v6  ;;  %v102_v11 = vmul.f32 1.442695, %v99_v7  ;;  %89 = vst [vmem:[#allocation11] sm:$0xff] %v87_v9  ;;  %v91_v47 = vmax.f32 %v452_v1, 0.0  ;;  %v93_v48 = vmul.f32 %v81_v15, %v452_v1 }
  0x14   :  { %199 = dma.vmem_to_hbm [thread:$0]  %s195_s1, 128, %s197_s7, [#allocation12]   ;;  %v94_v53 = vsub.f32 %v90_v40, %v92_v43 }
  0x15   :  { %v237_v12 = vpop.eup %236  ;;  %244 = vpow2.f32 %v100_v10  ;;  %v95_v56 = vsub.f32 %v91_v47, %v93_v48  ;;  %s413_s3 = smov [#allocation7]   ;;  %s163_s19 = sshll.u32 %s482_s2, 4  ;;  %s164_s19 = int_to_ptr.hbm [resolvable:$true] %s163_s19 }
  0x16   :  { %v239_v14 = vpop.eup %238  ;;  %v129_v16 = vmul.f32 0.6931472, %v237_v12  ;;  %246 = vpow2.f32 %v102_v11  ;;  %s161_s4 = sshll.u32 %s413_s3, 4  ;;  %s162_s4 = int_to_ptr.vmem [resolvable:$true] %s161_s4 }
  0x17   :  { %v241_v17 = vpop.eup %240  ;;  %v131_v18 = vmul.f32 0.6931472, %v239_v14 }
  0x18   :  { %v243_v19 = vpop.eup %242  ;;  %v132_v20 = vmax.f32 %v129_v16, -100.0  ;;  %v137_v21 = vmul.f32 0.6931472, %v241_v17 }
  0x19   :  { %v133_v23 = vmax.f32 %v131_v18, -100.0  ;;  %v139_v24 = vmul.f32 0.6931472, %v243_v19 }
  0x1a   :  { %v140_v26 = vmax.f32 %v137_v21, -100.0  ;;  %v142_v27 = vmul.f32 %v132_v20, %v80_v13 }
  0x1b   :  { %v245_v28 = vpop.eup %244  ;;  %v141_v29 = vmax.f32 %v139_v24, -100.0  ;;  %v143_v30 = vmul.f32 %v133_v23, %v81_v15 }
  0x1c   :  { %v247_v31 = vpop.eup %246  ;;  %v146_v32 = vmul.f32 %v144_v22, %v140_v26  ;;  %v104_v33 = vadd.f32 1.0, %v245_v28  ;;  %v107_v34 = vmul.f32 -0.5, %v245_v28  ;;  %v110_v44 = vand.u32 2147483647, %v245_v28 }
  0x1d   :  { %v147_v35 = vmul.f32 %v145_v25, %v141_v29  ;;  %v113_v36 = vadd.f32 1.0, %v247_v31  ;;  %v116_v37 = vmul.f32 -0.5, %v247_v31  ;;  %v119_v49 = vand.u32 2147483647, %v247_v31 }
  0x1e   :  { %v148_v38 = vadd.f32 %v146_v32, %v142_v27  ;;  %248 = vlog2.f32 %v104_v33  ;;  %v108_v41 = vadd.f32 1.0, %v107_v34  ;;  %vm111_vm0 = vcmp.lt.f32.partialorder %v110_v44, 0.0004427343 }
  0x1f   :  { %v149_v39 = vadd.f32 %v147_v35, %v143_v30  ;;  %250 = vlog2.f32 %v113_v36  ;;  %v117_v45 = vadd.f32 1.0, %v116_v37  ;;  %vm120_vm1 = vcmp.lt.f32.partialorder %v119_v49, 0.0004427343 }
  0x20   :  { %v150_v42 = vsub.f32 0.0, %v148_v38  ;;  %v109_v51 = vmul.f32 %v245_v28, %v108_v41 }
  0x21   :  { %v151_v46 = vsub.f32 0.0, %v149_v39  ;;  %v118_v54 = vmul.f32 %v247_v31, %v117_v45 }
  0x23   :  { %v153_v50 = vadd.f32 %v151_v46, %v150_v42 }
  0x24   :  { %v249_v52 = vpop.eup %248 }
  0x25   :  { %v251_v55 = vpop.eup %250  ;;  %v106_v57 = vmul.f32 0.6931472, %v249_v52  ;;  %155 = vst [vmem:[#allocation8] sm:$0xff] %v153_v50 }
  0x26   :  { %v115_v58 = vmul.f32 0.6931472, %v251_v55  ;;  %177 = dma.vmem_to_hbm [thread:$0]  %s173_s8, 128, %s175_s11, [#allocation9]  }
  0x27   :  { %v112_v59 = vsel %vm111_vm0, %v109_v51, %v106_v57  ;;  %188 = dma.vmem_to_hbm [thread:$0]  %s184_s13, 128, %s186_s16, [#allocation9]  }
  0x28   :  { %v121_v60 = vsel %vm120_vm1, %v118_v54, %v115_v58  ;;  %v122_v61 = vadd.f32 %v112_v59, %v94_v53 }
  0x29   :  { %v123_v62 = vadd.f32 %v121_v60, %v95_v56 }
  0x2b   :  { %v125_v63 = vadd.f32 %v123_v62, %v122_v61 }
  0x2d   :  { %127 = vst [vmem:[#allocation7] sm:$0xff] %v125_v63 }
  0x2e   :  { %166 = dma.vmem_to_hbm [thread:$0]  %s162_s4, 128, %s164_s19, [#allocation4]  }
  0x2f   :  { %400 = dma.done.wait [#allocation4], 128  }
  0x30   :  { %401 = vsyncadd [#allocation4], 4294967168 }
  0x31   :  { %402 = dma.done.wait [#allocation9], 256  }
  0x32   :  { %403 = vsyncadd [#allocation9], 4294967040 }
  0x33   :  { %404 = dma.done.wait [#allocation12], 128  }
  0x34   :  { %405 = vsyncadd [#allocation12], 4294967168 }
  0x35   :  { %216 = vsyncpa [#allocation3], 1 }
  0x36   :  { %217 = vsyncpa [#allocation6], 1 }
  0x37   :  { %218 = vsyncpa [#allocation4], 1 }
  0x38   :  { %219 = vsyncpa [#allocation9], 1 }
  0x39   :  { %220 = vsyncpa [#allocation12], 1 }

</bundles_post_ra>
